<compile_context>
chip_gen: v7x
topology: tpu7x:2x2x1
jax: 0.10.0
libtpu: 0.0.40
codegen_flags: <defaults>
</compile_context>

<pallas_src>
import functools

import jax
import jax.numpy as jnp
from jax import lax
from jax.experimental import pallas as pl
from jax.experimental.pallas import tpu as pltpu

_EPS = 1e-5          # nn.BatchNorm1d default eps
_LANE = 128          # vreg lane width
_SUBLANE = 8         # vreg sublane count


# ---------------------------------------------------------------------------
# Generation-aware VMEM budgets.
# ---------------------------------------------------------------------------
def _vmem_budgets():
    """Returns (tile_budget_bytes, vmem_limit_bytes) sized per TPU generation."""
    cap = None
    try:
        cap = getattr(pltpu.get_tpu_info(), "vmem_capacity_bytes", None)
    except Exception:
        cap = None
    if cap is None:                      # unknown / interpret: conservative
        return 16 << 20, 32 << 20
    if cap >= 96 << 20:                  # 128 MiB parts (v5e / v6e class)
        return 32 << 20, 80 << 20
    return 24 << 20, 48 << 20            # 64 MiB parts (v7x class)


# ---------------------------------------------------------------------------
# Kernels.
# ---------------------------------------------------------------------------
def _bn_fused_kernel(x_ref, gamma_ref, beta_ref, o_ref):
    """One (N, TC) channel block; stats reduce over the N (sublane) axis only."""
    xf = x_ref[...].astype(jnp.float32)            # no-op for f32 inputs
    inv_n = 1.0 / xf.shape[0]

    # Fused single traversal: sum and sum-of-squares together.
    s = jnp.sum(xf, axis=0, keepdims=True)         # (1, TC)   XLU
    sq = jnp.sum(xf * xf, axis=0, keepdims=True)   # (1, TC)
    mean = s * inv_n
    var = jnp.maximum(sq * inv_n - mean * mean, 0.0)   # clamp E[x^2]-E[x]^2 >= 0

    inv_std = lax.rsqrt(var + _EPS)                # EUP
    scale = inv_std * gamma_ref[...]               # f32 params, (1, TC)
    shift = beta_ref[...] - mean * scale

    # Single broadcasted FMA over the whole block.
    o_ref[...] = (xf * scale + shift).astype(o_ref.dtype)


def _bn_stats_kernel(x_ref, sum_ref, sq_ref, *, tn, n_total):
    """Two-pass path, pass 1: accumulate per-channel sum / sumsq over N tiles."""
    i = pl.program_id(1)                           # N-tile index (reduction axis, last)

    @pl.when(i == 0)
    def _():
        sum_ref[...] = jnp.zeros_like(sum_ref)
        sq_ref[...] = jnp.zeros_like(sq_ref)

    xf = x_ref[...].astype(jnp.float32)
    # Mask ragged rows of the last N tile (OOB rows must not pollute the sums).
    rows = lax.broadcasted_iota(jnp.int32, xf.shape, 0)
    xf = jnp.where(rows < (n_total - i * tn), xf, 0.0)

    sum_ref[...] += jnp.sum(xf, axis=0, keepdims=True)
    sq_ref[...] += jnp.sum(xf * xf, axis=0, keepdims=True)


def _bn_apply_kernel(x_ref, scale_ref, shift_ref, o_ref):
    """Two-pass path, pass 2: y = x * scale + shift over (TN, TC) tiles."""
    xf = x_ref[...].astype(jnp.float32)
    o_ref[...] = (xf * scale_ref[...] + shift_ref[...]).astype(o_ref.dtype)


# ---------------------------------------------------------------------------
# Tile selection.
# ---------------------------------------------------------------------------
def _pick_channel_tile(n, c, x_itemsize, budget_bytes):
    """Largest channel tile (multiple of 128, or full C when C <= 128) whose
    double-buffered in/out blocks plus f32 intermediates fit in budget_bytes.
    Returns 0 when even a 128-lane block does not fit (-> two-pass path)."""
    # 2x in + 2x out double buffers + one f32 intermediate + f32 FMA result.
    per_lane = n * (4 * x_itemsize + 8)
    tc_fit = (budget_bytes // max(per_lane, 1)) // _LANE * _LANE

    if c <= _LANE:
        # Block last dim must equal the full array dim when C < 128.
        return c if tc_fit >= _LANE else 0
    if tc_fit < _LANE:
        return 0

    c_pad = _LANE * pl.cdiv(c, _LANE)
    tc = min(tc_fit, c_pad)
    # Keep >= 2 channel blocks so the "parallel" axis actually shards across
    # both TensorCores on v7x (harmless on single-TC v5e/v6e).
    if c_pad >= 2 * _LANE:
        tc = min(tc, max(_LANE, (c_pad // 2) // _LANE * _LANE))
    return int(tc)


# ---------------------------------------------------------------------------
# Wrappers.
# ---------------------------------------------------------------------------
def _normalise_batch_two_pass(x, gamma2d, beta2d, budget, vmem_limit,
                              tn=None, tc=None):
    """Fallback when a full (N, 128) column block cannot live in VMEM."""
    n, c = x.shape

    if tc is None:
        tc = c if c <= _LANE else int(min(512, _LANE * pl.cdiv(c, _LANE)))
    if tn is None:
        per_row = tc * (4 * x.dtype.itemsize + 8)
        tn = (budget // max(per_row, 1)) // _SUBLANE * _SUBLANE
        tn = int(max(_SUBLANE, min(tn, n)))
    if tn >= n:
        tn = n

    # Pass 1: per-channel sum / sum-of-squares (reduction axis last in grid).
    sums, sqs = pl.pallas_call(
        functools.partial(_bn_stats_kernel, tn=tn, n_total=n),
        out_shape=(jax.ShapeDtypeStruct((1, c), jnp.float32),
                   jax.ShapeDtypeStruct((1, c), jnp.float32)),
        grid=(pl.cdiv(c, tc), pl.cdiv(n, tn)),
        in_specs=[pl.BlockSpec((tn, tc), lambda j, i: (i, j))],
        out_specs=(pl.BlockSpec((1, tc), lambda j, i: (0, j)),
                   pl.BlockSpec((1, tc), lambda j, i: (0, j))),
        compiler_params=pltpu.CompilerParams(
            dimension_semantics=("parallel", "arbitrary"),
            vmem_limit_bytes=vmem_limit,
        ),
    )(x)

    # Tiny (1, C) finalize in plain JAX: fold affine into scale/shift.
    inv_n = 1.0 / n
    mean = sums * inv_n
    var = jnp.maximum(sqs * inv_n - mean * mean, 0.0)
    scale = gamma2d * lax.rsqrt(var + _EPS)
    shift = beta2d - mean * scale

    # Pass 2: elementwise FMA, fully parallel grid.
    return pl.pallas_call(
        _bn_apply_kernel,
        out_shape=jax.ShapeDtypeStruct((n, c), x.dtype),
        grid=(pl.cdiv(n, tn), pl.cdiv(c, tc)),
        in_specs=[
            pl.BlockSpec((tn, tc), lambda i, j: (i, j)),
            pl.BlockSpec((1, tc), lambda i, j: (0, j)),
            pl.BlockSpec((1, tc), lambda i, j: (0, j)),
        ],
        out_specs=pl.BlockSpec((tn, tc), lambda i, j: (i, j)),
        compiler_params=pltpu.CompilerParams(
            dimension_semantics=("parallel", "parallel"),
            vmem_limit_bytes=vmem_limit,
        ),
    )(x, scale, shift)


def normalise_batch(x, gamma, beta):
    """BatchNorm1d training-mode forward for x of shape (N, C)."""
    n, c = x.shape
    gamma2d = gamma.reshape(1, c).astype(jnp.float32)   # keep params in f32
    beta2d = beta.reshape(1, c).astype(jnp.float32)

    budget, vmem_limit = _vmem_budgets()
    tc = _pick_channel_tile(n, c, x.dtype.itemsize, budget)

    if tc == 0:
        # N too large for a resident (N, 128) block under this VMEM budget.
        return _normalise_batch_two_pass(x, gamma2d, beta2d, budget, vmem_limit)

    cost = pl.CostEstimate(
        flops=7 * n * c,
        transcendentals=c,
        bytes_accessed=2 * n * c * x.dtype.itemsize,
    )
    # NOTE: pipeline_mode=pl.Buffered(3) on the x in_spec is a possible knob in
    # the small-block regime; default double buffering is sufficient here.
    return pl.pallas_call(
        _bn_fused_kernel,
        out_shape=jax.ShapeDtypeStruct((n, c), x.dtype),
        grid=(pl.cdiv(c, tc),),
        in_specs=[
            pl.BlockSpec((n, tc), lambda j: (0, j)),
            pl.BlockSpec((1, tc), lambda j: (0, j)),
            pl.BlockSpec((1, tc), lambda j: (0, j)),
        ],
        out_specs=pl.BlockSpec((n, tc), lambda j: (0, j)),
        compiler_params=pltpu.CompilerParams(
            dimension_semantics=("parallel",),
            vmem_limit_bytes=vmem_limit,
        ),
        cost_estimate=cost,
    )(x, gamma2d, beta2d)


def normalise(x, gamma=None, beta=None, dim=None, method="batch"):
    """Mirror of the PyTorch `Normalise` module.

    dim=None or method != 'batch'  -> identity
    otherwise                       -> BatchNorm1d(dim) training-mode forward.
    # TODO(synk): running_mean / running_var buffer updates are not produced
    # (forward-only normalization, matching training-mode statistics).
    """
    method = None if dim is None else method
    if method != "batch":
        return x
    return normalise_batch(x, gamma, beta)


if __name__ == "__main__":
    key = jax.random.PRNGKey(0)

    def ref_bn(x, gamma, beta):
        xf = x.astype(jnp.float32)
        mean = jnp.mean(xf, axis=0, keepdims=True)
        var = jnp.mean((xf - mean) ** 2, axis=0, keepdims=True)
        return ((xf - mean) / jnp.sqrt(var + _EPS) * gamma + beta).astype(x.dtype)

    # --- Small canonical case: (N, C) = (8, 32), BatchNorm1d default init.
    N, C = 8, 32
    x = jax.random.normal(key, (N, C), dtype=jnp.float32)
    gamma = jnp.ones((C,), dtype=jnp.float32)   # nn.BatchNorm1d: weight=1
    beta = jnp.zeros((C,), dtype=jnp.float32)   #                 bias=0
    out = jax.block_until_ready(normalise(x, gamma, beta, dim=C, method="batch"))
    assert jnp.allclose(out, ref_bn(x, gamma, beta), atol=1e-5, rtol=1e-5), \
        "mismatch vs reference (canonical case)"

    # --- Ragged channel count (C > 128, C % 128 != 0): exercises the unpadded
    #     multi-block path (masked last-block stores, no wrapper pad/slice).
    k1, k2, k3 = jax.random.split(key, 3)
    N2, C2 = 16, 200
    x2 = jax.random.normal(k1, (N2, C2), dtype=jnp.float32)
    g2 = jax.random.normal(k2, (C2,), dtype=jnp.float32)
    b2 = jax.random.normal(k3, (C2,), dtype=jnp.float32)
    out2 = jax.block_until_ready(normalise(x2, g2, b2, dim=C2, method="batch"))
    assert jnp.allclose(out2, ref_bn(x2, g2, b2), atol=1e-4, rtol=1e-4), \
        "mismatch vs reference (ragged-C case)"

    # --- Two-pass fallback path (large-N regime), forced at a small shape to
    #     validate the masked ragged-row accumulation and the apply pass.
    N3, C3 = 50, 200
    x3 = jax.random.normal(k2, (N3, C3), dtype=jnp.float32)
    out3 = jax.block_until_ready(
        _normalise_batch_two_pass(
            x3,
            g2.reshape(1, C3).astype(jnp.float32),
            b2.reshape(1, C3).astype(jnp.float32),
            budget=16 << 20, vmem_limit=32 << 20, tn=24, tc=128))
    assert jnp.allclose(out3, ref_bn(x3, g2, b2), atol=1e-4, rtol=1e-4), \
        "mismatch vs reference (two-pass case)"

    # --- Identity path (dim=None), matches `self.norm = lambda x: x`.
    out_id = normalise(x, dim=None)
    assert jnp.array_equal(out_id, x)

    print("KERNEL_OK")
</pallas_src>

<mosaic_0001>
module attributes {stable_mosaic.version = 11 : i64} {
  func.func @_bn_fused_kernel(%arg0: i32, %arg1: memref<8x32xf32, #tpu.memory_space<vmem>>, %arg2: memref<1x32xf32, #tpu.memory_space<vmem>>, %arg3: memref<1x32xf32, #tpu.memory_space<vmem>>, %arg4: memref<8x32xf32, #tpu.memory_space<vmem>>) attributes {dimension_semantics = [#tpu.dimension_semantics<parallel>], iteration_bounds = array<i64: 1>, scalar_prefetch = 0 : i64, scratch_operands = 0 : i64, tpu.core_type = #tpu.core_type<tc>, window_params = [{transform_indices = @transform_0, window_bounds = array<i64: 8, 32>}, {transform_indices = @transform_1, window_bounds = array<i64: 1, 32>}, {transform_indices = @transform_2, window_bounds = array<i64: 1, 32>}, {transform_indices = @transform_3, window_bounds = array<i64: 8, 32>}]} {
    %c0 = arith.constant 0 : index
    %c0_0 = arith.constant 0 : index
    %0 = vector.load %arg1[%c0, %c0_0] : memref<8x32xf32, #tpu.memory_space<vmem>>, vector<8x32xf32>
    %cst = arith.constant dense<0.000000e+00> : vector<32xf32>
    %1 = vector.multi_reduction <add>, %0, %cst [0] : vector<8x32xf32> to vector<32xf32>
    %2 = vector.shape_cast %1 : vector<32xf32> to vector<1x32xf32>
    %3 = arith.mulf %0, %0 : vector<8x32xf32>
    %cst_1 = arith.constant dense<0.000000e+00> : vector<32xf32>
    %4 = vector.multi_reduction <add>, %3, %cst_1 [0] : vector<8x32xf32> to vector<32xf32>
    %5 = vector.shape_cast %4 : vector<32xf32> to vector<1x32xf32>
    %cst_2 = arith.constant 1.250000e-01 : f32
    %6 = vector.broadcast %cst_2 : f32 to vector<1x32xf32>
    %7 = arith.mulf %2, %6 : vector<1x32xf32>
    %cst_3 = arith.constant 1.250000e-01 : f32
    %8 = vector.broadcast %cst_3 : f32 to vector<1x32xf32>
    %9 = arith.mulf %5, %8 : vector<1x32xf32>
    %10 = arith.mulf %7, %7 : vector<1x32xf32>
    %11 = arith.subf %9, %10 : vector<1x32xf32>
    %cst_4 = arith.constant 0.000000e+00 : f32
    %12 = vector.broadcast %cst_4 : f32 to vector<1x32xf32>
    %13 = arith.maximumf %11, %12 : vector<1x32xf32>
    %cst_5 = arith.constant 9.99999974E-6 : f32
    %14 = vector.broadcast %cst_5 : f32 to vector<1x32xf32>
    %15 = arith.addf %13, %14 : vector<1x32xf32>
    %16 = math.rsqrt %15 : vector<1x32xf32>
    %c0_6 = arith.constant 0 : index
    %c0_7 = arith.constant 0 : index
    %17 = vector.load %arg2[%c0_6, %c0_7] : memref<1x32xf32, #tpu.memory_space<vmem>>, vector<1x32xf32>
    %18 = arith.mulf %16, %17 : vector<1x32xf32>
    %c0_8 = arith.constant 0 : index
    %c0_9 = arith.constant 0 : index
    %19 = vector.load %arg3[%c0_8, %c0_9] : memref<1x32xf32, #tpu.memory_space<vmem>>, vector<1x32xf32>
    %20 = arith.mulf %7, %18 : vector<1x32xf32>
    %21 = arith.subf %19, %20 : vector<1x32xf32>
    %22 = vector.broadcast %18 : vector<1x32xf32> to vector<8x32xf32>
    %23 = arith.mulf %0, %22 : vector<8x32xf32>
    %24 = vector.broadcast %21 : vector<1x32xf32> to vector<8x32xf32>
    %25 = arith.addf %23, %24 : vector<8x32xf32>
    %c0_10 = arith.constant 0 : index
    %c0_11 = arith.constant 0 : index
    %26 = vector.load %arg4[%c0_10, %c0_11] : memref<8x32xf32, #tpu.memory_space<vmem>>, vector<8x32xf32>
    tpu.vector_store %arg4[%c0_10, %c0_11], %25 {strides = array<i32>} : memref<8x32xf32, #tpu.memory_space<vmem>>, vector<8x32xf32>,
    return
  }
  func.func @transform_0(%arg0: i32) -> (i32, i32) {
    %c0_i32 = arith.constant 0 : i32
    %c0_i32_0 = arith.constant 0 : i32
    return %c0_i32, %arg0 : i32, i32
  }
  func.func @transform_1(%arg0: i32) -> (i32, i32) {
    %c0_i32 = arith.constant 0 : i32
    %c0_i32_0 = arith.constant 0 : i32
    return %c0_i32, %arg0 : i32, i32
  }
  func.func @transform_2(%arg0: i32) -> (i32, i32) {
    %c0_i32 = arith.constant 0 : i32
    %c0_i32_0 = arith.constant 0 : i32
    return %c0_i32, %arg0 : i32, i32
  }
  func.func @transform_3(%arg0: i32) -> (i32, i32) {
    %c0_i32 = arith.constant 0 : i32
    %c0_i32_0 = arith.constant 0 : i32
    return %c0_i32, %arg0 : i32, i32
  }
}

</mosaic_0001>

<bundles_post_ra>
// kernel: tpu_custom_call.1
= control target key start
LH: loop header
LB: loop body
LE: loop exit
PB: predicated region body
PF: predicated region fallthrough
CT: control target
= control target key end

     0   :  { %8 = vsyncpa [#allocation3], 0  ;;  %s191_s0 = inlined_call_operand.hbm [shape: f32[8,32], index: 0, kind: input, shape index: {}]   ;;  %s192_s1 = inlined_call_operand.vmem [shape: f32[1,32], index: 1, kind: input, shape index: {}]   ;;  %s193_s2 = inlined_call_operand.vmem [shape: f32[1,32], index: 2, kind: input, shape index: {}]   ;;  %s194_s3 = inlined_call_operand.hbm [shape: f32[8,32], index: 3, kind: output, shape index: {}]  }
   0x1   :  { %9 = vsyncpa [#allocation4], 0  ;;  %s136_s12 = smov [#allocation2]   ;;  %s88_s16 = scalar_lea.hbm %s191_s0, 128 }
   0x2   :  { %s16_s13 = sshll.u32 %s136_s12, 4  ;;  %p89_p0 = scmp.ne.s32.totalorder %s191_s0, %s88_s16  ;;  %s17_s13 = int_to_ptr.vmem [resolvable:$true] %s16_s13 }
   0x3   :  { %p92_p1 = scmp.lt.u32.totalorder %s88_s16, %s191_s0 }
   0x5   :  { %p94_p2 = pnand %p92_p1, %p89_p0 }
   0x7   :  { %97 = shalt.err (!%p94_p2)
}
   0x8   :  { %s98_s21 = scalar_lea.vmem %s17_s13, 128  ;;  %p103_p4 = scmp.lt.s32.totalorder %s17_s13, %s17_s13 }
   0x9   :  { %p99_p3 = scmp.ne.s32.totalorder %s17_s13, %s98_s21  ;;  %p104_p5 = scmp.lt.s32.totalorder %s98_s21, %s98_s21 }
   0xb   :  { %p105_p6 = por %p104_p5, %p103_p4 }
   0xd   :  { %p106_p7 = pnand %p105_p6, %p99_p3 }
   0xf   :  { %109 = shalt.err (!%p106_p7)
}
  0x10   :  { %19 = dma.hbm_to_vmem [thread:$0]  %s191_s0, 128, %s17_s13, [#allocation3]  }
  0x11   :  { %132 = dma.done.wait [#allocation3], 128  }
  0x12   :  { %133 = vsyncadd [#allocation3], 4294967168  ;;  %vm28_vm0 = vcmask 261120   ;;  %v27_v0 = vld [vmem:[#allocation2] sm:$0xff]  ;;  %v56_v22 = vlaneseq  ;;  %s137_s27 = smov [#allocation5]  }
  0x13   :  { %v29_v1 = vsel %vm28_vm0, %v27_v0, 0.0  ;;  %v36_v2 = vmul.f32 %v27_v0, %v27_v0  ;;  %v51_v24 = vld [vmem:[%s192_s1] sm:$0x1]  ;;  %s75_s28 = sshll.u32 %s137_s27, 4  ;;  %s76_s28 = int_to_ptr.vmem [resolvable:$true] %s75_s28 }
  0x14   :  { %v30_v3 = vrot.slane %v29_v1, 4  ;;  %v57_v23 = vshrl.u32 %v56_v22, 7  ;;  %v53_v28 = vld [vmem:[%s193_s2] sm:$0x1]  ;;  %s110_s29 = scalar_lea.vmem %s76_s28, 128  ;;  %p115_p9 = scmp.lt.s32.totalorder %s76_s28, %s76_s28 }
  0x15   :  { %v37_v4 = vsel %vm28_vm0, %v36_v2, 0.0  ;;  %p111_p8 = scmp.ne.s32.totalorder %s76_s28, %s110_s29  ;;  %p116_p10 = scmp.lt.s32.totalorder %s110_s29, %s110_s29 }
  0x16   :  { %v31_v5 = vadd.f32 %v30_v3, %v29_v1  ;;  %v38_v6 = vrot.slane %v37_v4, 4  ;;  %v58_v25 = vsub.s32 0, %v57_v23 }
  0x17   :  { %p117_p11 = por %p116_p10, %p115_p9 }
  0x18   :  { %v32_v7 = vrot.slane %v31_v5, 2  ;;  %v39_v8 = vadd.f32 %v38_v6, %v37_v4 }
  0x19   :  { %p118_p12 = pnand %p117_p11, %p111_p8 }
  0x1a   :  { %v33_v9 = vadd.f32 %v32_v7, %v31_v5  ;;  %v40_v10 = vrot.slane %v39_v8, 2 }
  0x1c   :  { %v34_v11 = vrot.slane %v33_v9, 1  ;;  %v41_v12 = vadd.f32 %v40_v10, %v39_v8 }
  0x1e   :  { %v35_v13 = vadd.f32 %v34_v11, %v33_v9  ;;  %v42_v14 = vrot.slane %v41_v12, 1 }
  0x20   :  { %v43_v15 = vadd.f32 %v42_v14, %v41_v12  ;;  %v44_v16 = vmul.f32 0.125, %v35_v13 }
  0x22   :  { %v45_v17 = vmul.f32 0.125, %v43_v15  ;;  %v46_v18 = vmul.f32 %v44_v16, %v44_v16 }
  0x24   :  { %v47_v19 = vsub.f32 %v45_v17, %v46_v18 }
  0x26   :  { %v48_v20 = vmax.f32 %v47_v19, 0.0 }
  0x28   :  { %v49_v21 = vadd.f32 1e-05, %v48_v20 }
  0x2a   :  { %86 = vrsqrt.f32 %v49_v21 }
  0x34   :  { %v87_v26 = vpop.eup %86 }
  0x35   :  { %v52_v27 = vmul.f32 %v87_v26, %v51_v24 }
  0x37   :  { %v54_v29 = vmul.f32 %v52_v27, %v44_v16  ;;  %v59_v30 = vrot.slane %v52_v27, %v58_v25 }
  0x39   :  { %v55_v31 = vsub.f32 %v53_v28, %v54_v29  ;;  %v60_v32 = vmul.f32 %v59_v30, %v27_v0 }
  0x3b   :  { %v65_v33 = vrot.slane %v55_v31, %v58_v25 }
  0x3d   :  { %v67_v34 = vadd.f32 %v65_v33, %v60_v32 }
  0x3f   :  { %68 = vst.msk [vmem:[#allocation5] sm:$0xff] %vm28_vm0, %v67_v34 }
  0x40   :  { %121 = shalt.err (!%p118_p12)
}
  0x41   :  { %s122_s30 = scalar_lea.hbm %s194_s3, 128 }
  0x42   :  { %p123_p13 = scmp.ne.s32.totalorder %s194_s3, %s122_s30  ;;  %p126_p0 = scmp.lt.u32.totalorder %s122_s30, %s194_s3 }
  0x44   :  { %p128_p1 = pnand %p126_p0, %p123_p13 }
  0x46   :  { %131 = shalt.err (!%p128_p1)
}
  0x47   :  { %78 = dma.vmem_to_hbm [thread:$0]  %s76_s28, 128, %s194_s3, [#allocation4]  }
  0x48   :  { %134 = dma.done.wait [#allocation4], 128  }
  0x49   :  { %135 = vsyncadd [#allocation4], 4294967168 }
  0x4a   :  { %82 = vsyncpa [#allocation3], 1 }
  0x4b   :  { %83 = vsyncpa [#allocation4], 1 }

</bundles_post_ra>
